<compile_context>
chip_gen: v7x
topology: tpu7x:2x2x1
jax: 0.10.0
libtpu: 0.0.40
codegen_flags: <defaults>
</compile_context>

<pallas_src>
import functools

import jax
import jax.numpy as jnp
import numpy as np
from jax.experimental import pallas as pl
from jax.experimental.pallas import tpu as pltpu


# Double-buffered *input* bytes per grid step are budgeted against this; in-kernel f32
# temporaries roughly double it, so total stays well under the explicit VMEM limit
# below (and under v7x's 64 MiB physical VMEM).
_INPUT_VMEM_BUDGET = 12 << 20
_VMEM_LIMIT_BYTES = 48 << 20


def _finite_or_zero(x):
    # torch.nan_to_num(nan=0, posinf=0, neginf=0)
    return jnp.where(jnp.isfinite(x), x, jnp.zeros_like(x))


def _round_up(x, m):
    return ((x + m - 1) // m) * m


def _detect_num_tensorcores():
    """Best-effort TensorCore-per-chip count (2 only on 2-TC parts); falls back to 1."""
    try:
        info = pltpu.get_tpu_info()
        for name in ("num_cores", "core_count", "num_tensorcores", "num_tensor_cores"):
            v = getattr(info, name, None)
            if isinstance(v, (int, np.integer)) and int(v) >= 1:
                return min(int(v), 2)
    except Exception:
        pass
    return 1


def _make_loss_kernel(n_rays, tile_n, tiles_per_shard):
    """Kernel accumulating masked partial sums for one lane-dense ray tile.

    acc_ref block is (1, 8, 128), revisited across the tile axis (one block per shard).
    Sublane-row meanings (every lane of a row holds the same value; lane 0 is read on
    host): 0 eik_sum, 1 rgb_l1_sum, 2 inside_count, 3 smooth_sum, 4 mask2_count.
    """

    def kernel(sdf_ref, geik_ref, pk_ref, acc_ref):
        c = pl.program_id(0)
        t = pl.program_id(1)
        f32 = jnp.float32

        @pl.when(t == 0)
        def _():
            acc_ref[...] = jnp.zeros_like(acc_ref)

        # validity of each lane (ray): global ray index < true N (N is trace-time)
        start = (c * tiles_per_shard + t) * tile_n
        lane = start + jax.lax.broadcasted_iota(jnp.int32, (1, tile_n), 1)
        valid_b = lane < n_rays                              # (1, TN)
        valid = valid_b.astype(f32)

        pk = pk_ref[...].astype(f32)                         # (13, TN)
        inside = jnp.where(valid_b, pk[12:13, :], 0.0)       # (1, TN) ~outside, 0 on pad

        # foreground mask: (sdf > 0).any(S) & (sdf < 0).any(S)
        sdf = sdf_ref[...].astype(f32)                       # (S, TN)
        has_pos = jnp.max((sdf > 0.0).astype(f32), axis=0, keepdims=True)
        has_neg = jnp.max((sdf < 0.0).astype(f32), axis=0, keepdims=True)
        fg = has_pos * has_neg                               # (1, TN)

        # ---- eikonal: ((||g|| - 1)^2), mask=None -> sum over valid rays*samples ----
        gx = geik_ref[0].astype(f32)                         # (S, TN)
        gy = geik_ref[1].astype(f32)
        gz = geik_ref[2].astype(f32)
        gnorm = jnp.sqrt(gx * gx + gy * gy + gz * gz)
        eik_err = _finite_or_zero((gnorm - 1.0) ** 2) * valid
        eik_sum = jnp.sum(eik_err)

        # ---- rgb L1 with mask = ~outside ----
        err = _finite_or_zero(jnp.abs(pk[0:3, :] - pk[3:6, :]))
        rgb_sum = jnp.sum(err * inside)
        mask_sum = jnp.sum(inside)

        # ---- smooth loss with mask = ~outside & foreground ----
        # (exact sqrt/div kept for numerical parity with the reference; HBM-bound)
        g1 = pk[6:9, :]
        g2 = pk[9:12, :]
        n1 = g1 / (jnp.sqrt(jnp.sum(g1 * g1, axis=0, keepdims=True)) + 1e-6)
        n2 = g2 / (jnp.sqrt(jnp.sum(g2 * g2, axis=0, keepdims=True)) + 1e-6)
        d = n1 - n2
        se = _finite_or_zero(jnp.sqrt(jnp.sum(d * d, axis=0, keepdims=True)))  # (1, TN)
        mask2 = inside * fg
        smooth_sum = jnp.sum(se * mask2)
        mask2_sum = jnp.sum(mask2)

        # scatter the 5 scalars into sublane rows of an (8,128) update and accumulate.
        # (micro-opt candidate per review, but ~10 VALU ops/step is noise at these tiles)
        row = jax.lax.broadcasted_iota(jnp.int32, (8, 128), 0)
        upd = (jnp.where(row == 0, eik_sum, 0.0)
               + jnp.where(row == 1, rgb_sum, 0.0)
               + jnp.where(row == 2, mask_sum, 0.0)
               + jnp.where(row == 3, smooth_sum, 0.0)
               + jnp.where(row == 4, mask2_sum, 0.0))
        acc_ref[...] += upd[None]

    return kernel


def _compute_loss_partials(sdf_t, geik_t, packed, n_rays, tile_n, nc):
    S, n_pad = sdf_t.shape
    tiles_per_shard = n_pad // (tile_n * nc)

    def m2(c, t):                     # 2-D arrays [D, Np]
        return (0, c * tiles_per_shard + t)

    def m3(c, t):                     # grad_eik [3, S, Np]
        return (0, 0, c * tiles_per_shard + t)

    kernel = _make_loss_kernel(n_rays, tile_n, tiles_per_shard)
    out = pl.pallas_call(
        kernel,
        out_shape=jax.ShapeDtypeStruct((nc, 8, 128), jnp.float32),
        grid=(nc, tiles_per_shard),
        in_specs=[
            pl.BlockSpec((S, tile_n), m2),       # sdf       [S, Np]
            pl.BlockSpec((3, S, tile_n), m3),    # grad_eik  [3, S, Np]
            pl.BlockSpec((13, tile_n), m2),      # packed    [13, Np]
        ],
        out_specs=pl.BlockSpec((1, 8, 128), lambda c, t: (c, 0, 0)),
        compiler_params=pltpu.CompilerParams(
            dimension_semantics=("parallel", "arbitrary"),
            vmem_limit_bytes=_VMEM_LIMIT_BYTES),
    )(sdf_t, geik_t, packed)
    return out[:, :, 0]                          # (nc, 8) per-shard partial sums


def sequential_lr(progress, lr):
    if isinstance(lr, (int, float)):
        return lr
    return lr[2] + min(1.0, max(0.0, (progress - lr[0]) / (lr[1] - lr[0]))) * (lr[3] - lr[2])


class ImplicitReconLoss:
    """JAX / Pallas port of models.loss.ImplicitReconLoss (default-lambda forward path)."""

    def __init__(self, lambda_rgb_l1=1.0, lambda_eik=0.05, lambda_smooth=0.005,
                 warm_up_end=2000, anneal_quat_end=0.2, if_reweight=False,
                 re_weight_params=(25, 15, 2), max_tile_n=32768, num_shards=None):
        self.lambda_rgb_l1 = functools.partial(sequential_lr, lr=lambda_rgb_l1)
        self.lambda_eik = functools.partial(sequential_lr, lr=lambda_eik)
        self.lambda_smooth = functools.partial(sequential_lr, lr=lambda_smooth)
        self.warm_up_end = warm_up_end
        self.anneal_quat_end = anneal_quat_end
        self.if_reweight = if_reweight
        self.re_weight_params = re_weight_params
        self.patch_size = (32, 32)
        assert max_tile_n % 128 == 0
        self.max_tile_n = max_tile_n
        # None -> best-effort TensorCore detection (defaults to 1; set 2 on v7x-class parts)
        self.num_shards = num_shards

    def _tile_plan(self, N, S, itemsize, pk_itemsize):
        # per-ray HBM/VMEM bytes per grid step: sdf (S) + grad_eik (3S) in native dtype,
        # packed block sublane-padded 13 -> 16 rows in VMEM.
        per_ray = (3 * S + S) * itemsize + 16 * pk_itemsize
        cap = max(128, (_INPUT_VMEM_BUDGET // (2 * per_ray)) // 128 * 128)
        tile_n = int(min(self.max_tile_n, cap, _round_up(N, 128)))
        tile_n = max(128, (tile_n // 128) * 128)
        num_tiles = -(-N // tile_n)
        nc = self.num_shards if self.num_shards is not None else _detect_num_tensorcores()
        nc = max(1, min(int(nc), 2))
        if num_tiles < 2:
            nc = 1
        num_tiles = _round_up(num_tiles, nc)
        return tile_n, num_tiles, nc

    def __call__(self, output, sample, prog):
        rgb_pred = output['rgb']                              # [N, 3]
        rgb_gt = sample['rgb']                                # [N, 3]
        outside = output['outside']                           # [N, 1], truthy = outside
        sdf = output['sdf'][..., 0]                           # [N, S]
        grad_eik = output['gradient_eik']                     # [N, S, 3]
        g1 = output['gradient_smooth'][:, 0, :]               # [N, 3]
        g2 = output['gradient_smooth_neighbor'][:, 0, :]      # [N, 3]

        N, S = sdf.shape
        pdtype = rgb_pred.dtype
        tile_n, num_tiles, nc = self._tile_plan(
            N, S, np.dtype(grad_eik.dtype).itemsize, np.dtype(pdtype).itemsize)
        n_pad = num_tiles * tile_n

        def pad_last(x):
            if x.shape[-1] == n_pad:
                return x
            widths = [(0, 0)] * (x.ndim - 1) + [(0, n_pad - x.shape[-1])]
            return jnp.pad(x, widths)

        # channels-first / lane-dense layout (rays on the 128-lane axis), native dtypes.
        # TODO(synk): these transposes are the remaining end-to-end HBM cost; removed
        #             entirely if the model emits channels-first tensors.
        sdf_t = pad_last(sdf.T)                                            # [S, Np]
        geik_t = pad_last(jnp.transpose(grad_eik, (2, 1, 0)))              # [3, S, Np]
        inside_f = jnp.logical_not(outside.astype(bool)).astype(pdtype)    # [N, 1]
        packed = pad_last(jnp.concatenate(
            [rgb_pred.astype(pdtype), rgb_gt.astype(pdtype),
             g1.astype(pdtype), g2.astype(pdtype), inside_f], axis=1).T)   # [13, Np]

        partials = _compute_loss_partials(sdf_t, geik_t, packed, N, tile_n, nc)
        sums = jnp.sum(partials, axis=0)                                   # (8,)
        eik_sum, rgb_sum, mask_sum = sums[0], sums[1], sums[2]
        smooth_sum, mask2_sum = sums[3], sums[4]

        # eikonal_loss(..., mask=None) -> plain mean over the TRUE N*S entries
        loss_eik = eik_sum / jnp.float32(N * S)
        # l1_loss(..., mask=~outside): sum(err*mask)/M/3 ; 0 if M==0 (safe denom: counts
        # are integers, so max(M,1) never changes a nonzero result)
        loss_rgb_l1 = jnp.where(mask_sum > 0,
                                rgb_sum / jnp.maximum(mask_sum, 1.0) / 3.0, 0.0)
        # smooth_loss(..., mask=~outside & fg): sum(err*mask)/M/1 ; 0 if M==0
        loss_smooth = jnp.where(mask2_sum > 0,
                                smooth_sum / jnp.maximum(mask2_sum, 1.0), 0.0)

        losses = {'eik': loss_eik}
        loss = self.lambda_eik(prog) * loss_eik
        if self.lambda_rgb_l1(prog) > 0:
            loss = loss + self.lambda_rgb_l1(prog) * loss_rgb_l1
            losses['rgb_l1'] = loss_rgb_l1
        if self.lambda_smooth(prog) > 0:
            loss = loss + self.lambda_smooth(prog) * loss_smooth
            losses['smooth'] = loss_smooth
        losses['total'] = loss
        return losses


# ------------------------- pure-JAX reference (for validation) -------------------------
def _reference_losses(output, sample):
    f32 = jnp.float32
    sdf = output['sdf'][..., 0].astype(f32)
    inside = jnp.logical_not(output['outside'].astype(bool)).astype(f32)     # [N,1]
    fg = (jnp.any(sdf > 0.0, -1, keepdims=True)
          & jnp.any(sdf < 0.0, -1, keepdims=True)).astype(f32)               # [N,1]

    g = output['gradient_eik'].astype(f32)
    eik = jnp.mean(_finite_or_zero((jnp.linalg.norm(g, axis=-1) - 1.0) ** 2))

    err = _finite_or_zero(jnp.abs(output['rgb'].astype(f32) - sample['rgb'].astype(f32)))
    M = jnp.sum(inside)
    rgb_l1 = jnp.where(M > 0, jnp.sum(err * inside) / M / 3.0, 0.0)

    g1 = output['gradient_smooth'].astype(f32)                               # [N,1,3]
    g2 = output['gradient_smooth_neighbor'].astype(f32)
    n1 = g1 / (jnp.linalg.norm(g1, axis=-1, keepdims=True) + 1e-6)
    n2 = g2 / (jnp.linalg.norm(g2, axis=-1, keepdims=True) + 1e-6)
    se = _finite_or_zero(jnp.linalg.norm(n1 - n2, axis=-1))                  # [N,1]
    m2 = inside * fg
    M2 = jnp.sum(m2)
    smooth = jnp.where(M2 > 0, jnp.sum(se * m2) / M2 / 1.0, 0.0)

    total = 0.05 * eik + 1.0 * rgb_l1 + 0.005 * smooth
    return {'eik': eik, 'rgb_l1': rgb_l1, 'smooth': smooth, 'total': total}


if __name__ == "__main__":
    def make_case(key, N, S):
        ks = jax.random.split(key, 8)
        rgb_pred = jax.random.uniform(ks[0], (N, 3), jnp.float32)
        rgb_gt = jax.random.uniform(ks[1], (N, 3), jnp.float32)
        sdf = jax.random.normal(ks[2], (N, S, 1), jnp.float32)
        grad_eik = jax.random.normal(ks[3], (N, S, 3), jnp.float32)
        g_smooth = jax.random.normal(ks[4], (N, 1, 3), jnp.float32)
        g_smooth_nbr = g_smooth + 0.1 * jax.random.normal(ks[5], (N, 1, 3), jnp.float32)
        outside = jax.random.bernoulli(ks[6], 0.1, (N, 1))
        mask = jax.random.bernoulli(ks[7], 0.9, (N, 1))
        output = {'outside': outside, 'sdf': sdf, 'rgb': rgb_pred,
                  'gradient_eik': grad_eik, 'gradient_smooth': g_smooth,
                  'gradient_smooth_neighbor': g_smooth_nbr}
        sample = {'rgb': rgb_gt, 'mask': mask}
        return output, sample

    key = jax.random.PRNGKey(0)
    k1, k2, k3 = jax.random.split(key, 3)

    def check(losses, ref):
        jax.block_until_ready(losses['total'])
        for k in ('eik', 'rgb_l1', 'smooth', 'total'):
            np.testing.assert_allclose(np.asarray(losses[k]), np.asarray(ref[k]),
                                       rtol=1e-5, atol=1e-5)
        if bool(jnp.isnan(losses['total'])):
            raise ValueError('loss is nan')

    # case 1: N=256 (single tile, single shard, default tile plan)
    output, sample = make_case(k1, N=256, S=8)
    check(ImplicitReconLoss()(output, sample, prog=0.5), _reference_losses(output, sample))

    # case 2: N not a multiple of the tile -> padding mask + multi-step accumulation
    output2, sample2 = make_case(k2, N=600, S=8)
    check(ImplicitReconLoss(max_tile_n=128)(output2, sample2, prog=0.5),
          _reference_losses(output2, sample2))

    # case 3: explicit 2-shard ("parallel") grid axis, incl. round-up padded tile
    output3, sample3 = make_case(k3, N=600, S=8)
    check(ImplicitReconLoss(max_tile_n=128, num_shards=2)(output3, sample3, prog=0.5),
          _reference_losses(output3, sample3))

    print("KERNEL_OK")
</pallas_src>

<mosaic_0001>
module attributes {stable_mosaic.version = 11 : i64} {
  func.func @kernel(%arg0: i32, %arg1: i32, %arg2: memref<8x256xf32, #tpu.memory_space<vmem>>, %arg3: memref<3x8x256xf32, #tpu.memory_space<vmem>>, %arg4: memref<13x256xf32, #tpu.memory_space<vmem>>, %arg5: memref<1x8x128xf32, #tpu.memory_space<vmem>>) attributes {dimension_semantics = [#tpu.dimension_semantics<parallel>, #tpu.dimension_semantics<arbitrary>], iteration_bounds = array<i64: 1, 1>, scalar_prefetch = 0 : i64, scratch_operands = 0 : i64, tpu.core_type = #tpu.core_type<tc>, window_params = [{transform_indices = @transform_0, window_bounds = array<i64: 8, 256>}, {transform_indices = @transform_1, window_bounds = array<i64: 3, 8, 256>}, {transform_indices = @transform_2, window_bounds = array<i64: 13, 256>}, {transform_indices = @transform_3, window_bounds = array<i64: 1, 8, 128>}]} {
    %c0_i32 = arith.constant 0 : i32
    %0 = arith.cmpi eq, %arg1, %c0_i32 : i32
    %1 = arith.extui %0 : i1 to i32
    %c0_i32_0 = arith.constant 0 : i32
    %2 = arith.cmpi ne, %1, %c0_i32_0 : i32
    scf.if %2 {
      %cst_46 = arith.constant 0.000000e+00 : f32
      %145 = vector.broadcast %cst_46 : f32 to vector<1x8x128xf32>
      %c0_47 = arith.constant 0 : index
      %c0_48 = arith.constant 0 : index
      %c0_49 = arith.constant 0 : index
      %146 = vector.load %arg5[%c0_47, %c0_48, %c0_49] : memref<1x8x128xf32, #tpu.memory_space<vmem>>, vector<1x8x128xf32>
      tpu.vector_store %arg5[%c0_47, %c0_48, %c0_49], %145 {strides = array<i32>} : memref<1x8x128xf32, #tpu.memory_space<vmem>>, vector<1x8x128xf32>,
    } else {
    }
    %c1_i32 = arith.constant 1 : i32
    %3 = arith.muli %arg0, %c1_i32 : i32
    %4 = arith.addi %3, %arg1 : i32
    %c256_i32 = arith.constant 256 : i32
    %5 = arith.muli %4, %c256_i32 : i32
    %6 = tpu.iota {dimensions = array<i32: 1>} : vector<1x256xi32>
    %7 = vector.broadcast %5 : i32 to vector<1x256xi32>
    %8 = arith.addi %7, %6 : vector<1x256xi32>
    %c256_i32_1 = arith.constant 256 : i32
    %9 = vector.broadcast %c256_i32_1 : i32 to vector<1x256xi32>
    %10 = arith.cmpi slt, %8, %9 : vector<1x256xi32>
    %11 = arith.extui %10 : vector<1x256xi1> to vector<1x256xi32>
    %12 = arith.sitofp %11 : vector<1x256xi32> to vector<1x256xf32>
    %c0 = arith.constant 0 : index
    %c0_2 = arith.constant 0 : index
    %13 = vector.load %arg4[%c0, %c0_2] : memref<13x256xf32, #tpu.memory_space<vmem>>, vector<13x256xf32>
    %14 = vector.extract_strided_slice %13 {offsets = [12, 0], sizes = [1, 256], strides = [1, 1]} : vector<13x256xf32> to vector<1x256xf32>
    %cst = arith.constant 0.000000e+00 : f32
    %15 = vector.broadcast %cst : f32 to vector<1x256xf32>
    %16 = arith.select %10, %14, %15 : vector<1x256xi1>, vector<1x256xf32>
    %c0_3 = arith.constant 0 : index
    %c0_4 = arith.constant 0 : index
    %17 = vector.load %arg2[%c0_3, %c0_4] : memref<8x256xf32, #tpu.memory_space<vmem>>, vector<8x256xf32>
    %cst_5 = arith.constant 0.000000e+00 : f32
    %18 = vector.broadcast %cst_5 : f32 to vector<8x256xf32>
    %19 = arith.cmpf ogt, %17, %18 : vector<8x256xf32>
    %20 = arith.extui %19 : vector<8x256xi1> to vector<8x256xi32>
    %21 = arith.sitofp %20 : vector<8x256xi32> to vector<8x256xf32>
    %cst_6 = arith.constant dense<0xFF800000> : vector<256xf32>
    %22 = vector.multi_reduction <maximumf>, %21, %cst_6 [0] : vector<8x256xf32> to vector<256xf32>
    %23 = vector.shape_cast %22 : vector<256xf32> to vector<1x256xf32>
    %cst_7 = arith.constant 0.000000e+00 : f32
    %24 = vector.broadcast %cst_7 : f32 to vector<8x256xf32>
    %25 = arith.cmpf olt, %17, %24 : vector<8x256xf32>
    %26 = arith.extui %25 : vector<8x256xi1> to vector<8x256xi32>
    %27 = arith.sitofp %26 : vector<8x256xi32> to vector<8x256xf32>
    %cst_8 = arith.constant dense<0xFF800000> : vector<256xf32>
    %28 = vector.multi_reduction <maximumf>, %27, %cst_8 [0] : vector<8x256xf32> to vector<256xf32>
    %29 = vector.shape_cast %28 : vector<256xf32> to vector<1x256xf32>
    %30 = arith.mulf %23, %29 : vector<1x256xf32>
    %c0_9 = arith.constant 0 : index
    %c0_10 = arith.constant 0 : index
    %c0_11 = arith.constant 0 : index
    %31 = vector.load %arg3[%c0_9, %c0_10, %c0_11] : memref<3x8x256xf32, #tpu.memory_space<vmem>>, vector<1x8x256xf32>
    %32 = vector.shape_cast %31 : vector<1x8x256xf32> to vector<8x256xf32>
    %c1 = arith.constant 1 : index
    %c0_12 = arith.constant 0 : index
    %c0_13 = arith.constant 0 : index
    %33 = vector.load %arg3[%c1, %c0_12, %c0_13] : memref<3x8x256xf32, #tpu.memory_space<vmem>>, vector<1x8x256xf32>
    %34 = vector.shape_cast %33 : vector<1x8x256xf32> to vector<8x256xf32>
    %c2 = arith.constant 2 : index
    %c0_14 = arith.constant 0 : index
    %c0_15 = arith.constant 0 : index
    %35 = vector.load %arg3[%c2, %c0_14, %c0_15] : memref<3x8x256xf32, #tpu.memory_space<vmem>>, vector<1x8x256xf32>
    %36 = vector.shape_cast %35 : vector<1x8x256xf32> to vector<8x256xf32>
    %37 = arith.mulf %32, %32 : vector<8x256xf32>
    %38 = arith.mulf %34, %34 : vector<8x256xf32>
    %39 = arith.addf %37, %38 : vector<8x256xf32>
    %40 = arith.mulf %36, %36 : vector<8x256xf32>
    %41 = arith.addf %39, %40 : vector<8x256xf32>
    %42 = math.sqrt %41 : vector<8x256xf32>
    %cst_16 = arith.constant 1.000000e+00 : f32
    %43 = vector.broadcast %cst_16 : f32 to vector<8x256xf32>
    %44 = arith.subf %42, %43 : vector<8x256xf32>
    %45 = arith.mulf %44, %44 : vector<8x256xf32>
    %46 = tpu.weird %45 : vector<8x256xf32> -> vector<8x256xi1>
    %cst_17 = arith.constant dense<true> : vector<8x256xi1>
    %47 = arith.xori %46, %cst_17 : vector<8x256xi1>
    %cst_18 = arith.constant 0.000000e+00 : f32
    %48 = vector.broadcast %cst_18 : f32 to vector<8x256xf32>
    %49 = arith.select %47, %45, %48 : vector<8x256xi1>, vector<8x256xf32>
    %50 = vector.broadcast %12 : vector<1x256xf32> to vector<8x256xf32>
    %51 = arith.mulf %49, %50 : vector<8x256xf32>
    %52 = vector.shape_cast %51 : vector<8x256xf32> to vector<1x8x256xf32>
    %cst_19 = arith.constant dense<0.000000e+00> : vector<1xf32>
    %53 = vector.multi_reduction <add>, %52, %cst_19 [1, 2] : vector<1x8x256xf32> to vector<1xf32>
    %54 = vector.shape_cast %53 : vector<1xf32> to vector<1x1x1xf32>
    %55 = vector.extract %54[0, 0, 0] : f32 from vector<1x1x1xf32>
    %56 = vector.extract_strided_slice %13 {offsets = [0, 0], sizes = [3, 256], strides = [1, 1]} : vector<13x256xf32> to vector<3x256xf32>
    %57 = vector.extract_strided_slice %13 {offsets = [3, 0], sizes = [3, 256], strides = [1, 1]} : vector<13x256xf32> to vector<3x256xf32>
    %58 = arith.subf %56, %57 : vector<3x256xf32>
    %59 = math.absf %58 : vector<3x256xf32>
    %60 = tpu.weird %59 : vector<3x256xf32> -> vector<3x256xi1>
    %cst_20 = arith.constant dense<true> : vector<3x256xi1>
    %61 = arith.xori %60, %cst_20 : vector<3x256xi1>
    %cst_21 = arith.constant 0.000000e+00 : f32
    %62 = vector.broadcast %cst_21 : f32 to vector<3x256xf32>
    %63 = arith.select %61, %59, %62 : vector<3x256xi1>, vector<3x256xf32>
    %64 = vector.broadcast %16 : vector<1x256xf32> to vector<3x256xf32>
    %65 = arith.mulf %63, %64 : vector<3x256xf32>
    %66 = vector.shape_cast %65 : vector<3x256xf32> to vector<1x3x256xf32>
    %cst_22 = arith.constant dense<0.000000e+00> : vector<1xf32>
    %67 = vector.multi_reduction <add>, %66, %cst_22 [1, 2] : vector<1x3x256xf32> to vector<1xf32>
    %68 = vector.shape_cast %67 : vector<1xf32> to vector<1x1x1xf32>
    %69 = vector.extract %68[0, 0, 0] : f32 from vector<1x1x1xf32>
    %70 = vector.shape_cast %16 : vector<1x256xf32> to vector<1x1x256xf32>
    %cst_23 = arith.constant dense<0.000000e+00> : vector<1xf32>
    %71 = vector.multi_reduction <add>, %70, %cst_23 [1, 2] : vector<1x1x256xf32> to vector<1xf32>
    %72 = vector.shape_cast %71 : vector<1xf32> to vector<1x1x1xf32>
    %73 = vector.extract %72[0, 0, 0] : f32 from vector<1x1x1xf32>
    %74 = vector.extract_strided_slice %13 {offsets = [6, 0], sizes = [3, 256], strides = [1, 1]} : vector<13x256xf32> to vector<3x256xf32>
    %75 = vector.extract_strided_slice %13 {offsets = [9, 0], sizes = [3, 256], strides = [1, 1]} : vector<13x256xf32> to vector<3x256xf32>
    %76 = arith.mulf %74, %74 : vector<3x256xf32>
    %cst_24 = arith.constant dense<0.000000e+00> : vector<256xf32>
    %77 = vector.multi_reduction <add>, %76, %cst_24 [0] : vector<3x256xf32> to vector<256xf32>
    %78 = vector.shape_cast %77 : vector<256xf32> to vector<1x256xf32>
    %79 = math.sqrt %78 : vector<1x256xf32>
    %cst_25 = arith.constant 9.99999997E-7 : f32
    %80 = vector.broadcast %cst_25 : f32 to vector<1x256xf32>
    %81 = arith.addf %79, %80 : vector<1x256xf32>
    %82 = vector.broadcast %81 : vector<1x256xf32> to vector<3x256xf32>
    %83 = arith.divf %74, %82 : vector<3x256xf32>
    %84 = arith.mulf %75, %75 : vector<3x256xf32>
    %cst_26 = arith.constant dense<0.000000e+00> : vector<256xf32>
    %85 = vector.multi_reduction <add>, %84, %cst_26 [0] : vector<3x256xf32> to vector<256xf32>
    %86 = vector.shape_cast %85 : vector<256xf32> to vector<1x256xf32>
    %87 = math.sqrt %86 : vector<1x256xf32>
    %cst_27 = arith.constant 9.99999997E-7 : f32
    %88 = vector.broadcast %cst_27 : f32 to vector<1x256xf32>
    %89 = arith.addf %87, %88 : vector<1x256xf32>
    %90 = vector.broadcast %89 : vector<1x256xf32> to vector<3x256xf32>
    %91 = arith.divf %75, %90 : vector<3x256xf32>
    %92 = arith.subf %83, %91 : vector<3x256xf32>
    %93 = arith.mulf %92, %92 : vector<3x256xf32>
    %cst_28 = arith.constant dense<0.000000e+00> : vector<256xf32>
    %94 = vector.multi_reduction <add>, %93, %cst_28 [0] : vector<3x256xf32> to vector<256xf32>
    %95 = vector.shape_cast %94 : vector<256xf32> to vector<1x256xf32>
    %96 = math.sqrt %95 : vector<1x256xf32>
    %97 = tpu.weird %96 : vector<1x256xf32> -> vector<1x256xi1>
    %cst_29 = arith.constant dense<true> : vector<1x256xi1>
    %98 = arith.xori %97, %cst_29 : vector<1x256xi1>
    %cst_30 = arith.constant 0.000000e+00 : f32
    %99 = vector.broadcast %cst_30 : f32 to vector<1x256xf32>
    %100 = arith.select %98, %96, %99 : vector<1x256xi1>, vector<1x256xf32>
    %101 = arith.mulf %16, %30 : vector<1x256xf32>
    %102 = arith.mulf %100, %101 : vector<1x256xf32>
    %103 = vector.shape_cast %102 : vector<1x256xf32> to vector<1x1x256xf32>
    %cst_31 = arith.constant dense<0.000000e+00> : vector<1xf32>
    %104 = vector.multi_reduction <add>, %103, %cst_31 [1, 2] : vector<1x1x256xf32> to vector<1xf32>
    %105 = vector.shape_cast %104 : vector<1xf32> to vector<1x1x1xf32>
    %106 = vector.extract %105[0, 0, 0] : f32 from vector<1x1x1xf32>
    %107 = vector.shape_cast %101 : vector<1x256xf32> to vector<1x1x256xf32>
    %cst_32 = arith.constant dense<0.000000e+00> : vector<1xf32>
    %108 = vector.multi_reduction <add>, %107, %cst_32 [1, 2] : vector<1x1x256xf32> to vector<1xf32>
    %109 = vector.shape_cast %108 : vector<1xf32> to vector<1x1x1xf32>
    %110 = vector.extract %109[0, 0, 0] : f32 from vector<1x1x1xf32>
    %111 = tpu.iota {dimensions = array<i32: 0>} : vector<8x128xi32>
    %c0_i32_33 = arith.constant 0 : i32
    %112 = vector.broadcast %c0_i32_33 : i32 to vector<8x128xi32>
    %113 = arith.cmpi eq, %111, %112 : vector<8x128xi32>
    %cst_34 = arith.constant 0.000000e+00 : f32
    %114 = vector.broadcast %55 : f32 to vector<8x128xf32>
    %115 = vector.broadcast %cst_34 : f32 to vector<8x128xf32>
    %116 = arith.select %113, %114, %115 : vector<8x128xi1>, vector<8x128xf32>
    %c1_i32_35 = arith.constant 1 : i32
    %117 = vector.broadcast %c1_i32_35 : i32 to vector<8x128xi32>
    %118 = arith.cmpi eq, %111, %117 : vector<8x128xi32>
    %cst_36 = arith.constant 0.000000e+00 : f32
    %119 = vector.broadcast %69 : f32 to vector<8x128xf32>
    %120 = vector.broadcast %cst_36 : f32 to vector<8x128xf32>
    %121 = arith.select %118, %119, %120 : vector<8x128xi1>, vector<8x128xf32>
    %122 = arith.addf %116, %121 : vector<8x128xf32>
    %c2_i32 = arith.constant 2 : i32
    %123 = vector.broadcast %c2_i32 : i32 to vector<8x128xi32>
    %124 = arith.cmpi eq, %111, %123 : vector<8x128xi32>
    %cst_37 = arith.constant 0.000000e+00 : f32
    %125 = vector.broadcast %73 : f32 to vector<8x128xf32>
    %126 = vector.broadcast %cst_37 : f32 to vector<8x128xf32>
    %127 = arith.select %124, %125, %126 : vector<8x128xi1>, vector<8x128xf32>
    %128 = arith.addf %122, %127 : vector<8x128xf32>
    %c3_i32 = arith.constant 3 : i32
    %129 = vector.broadcast %c3_i32 : i32 to vector<8x128xi32>
    %130 = arith.cmpi eq, %111, %129 : vector<8x128xi32>
    %cst_38 = arith.constant 0.000000e+00 : f32
    %131 = vector.broadcast %106 : f32 to vector<8x128xf32>
    %132 = vector.broadcast %cst_38 : f32 to vector<8x128xf32>
    %133 = arith.select %130, %131, %132 : vector<8x128xi1>, vector<8x128xf32>
    %134 = arith.addf %128, %133 : vector<8x128xf32>
    %c4_i32 = arith.constant 4 : i32
    %135 = vector.broadcast %c4_i32 : i32 to vector<8x128xi32>
    %136 = arith.cmpi eq, %111, %135 : vector<8x128xi32>
    %cst_39 = arith.constant 0.000000e+00 : f32
    %137 = vector.broadcast %110 : f32 to vector<8x128xf32>
    %138 = vector.broadcast %cst_39 : f32 to vector<8x128xf32>
    %139 = arith.select %136, %137, %138 : vector<8x128xi1>, vector<8x128xf32>
    %140 = arith.addf %134, %139 : vector<8x128xf32>
    %c0_40 = arith.constant 0 : index
    %c0_41 = arith.constant 0 : index
    %c0_42 = arith.constant 0 : index
    %141 = vector.load %arg5[%c0_40, %c0_41, %c0_42] : memref<1x8x128xf32, #tpu.memory_space<vmem>>, vector<1x8x128xf32>
    %142 = vector.shape_cast %140 : vector<8x128xf32> to vector<1x8x128xf32>
    %143 = arith.addf %141, %142 : vector<1x8x128xf32>
    %c0_43 = arith.constant 0 : index
    %c0_44 = arith.constant 0 : index
    %c0_45 = arith.constant 0 : index
    %144 = vector.load %arg5[%c0_43, %c0_44, %c0_45] : memref<1x8x128xf32, #tpu.memory_space<vmem>>, vector<1x8x128xf32>
    tpu.vector_store %arg5[%c0_43, %c0_44, %c0_45], %143 {strides = array<i32>} : memref<1x8x128xf32, #tpu.memory_space<vmem>>, vector<1x8x128xf32>,
    return
  }
  func.func @transform_0(%arg0: i32, %arg1: i32) -> (i32, i32) {
    %c1_i32 = arith.constant 1 : i32
    %0 = arith.muli %arg0, %c1_i32 : i32
    %1 = arith.addi %0, %arg1 : i32
    %c0_i32 = arith.constant 0 : i32
    %c0_i32_0 = arith.constant 0 : i32
    return %c0_i32, %1 : i32, i32
  }
  func.func @transform_1(%arg0: i32, %arg1: i32) -> (i32, i32, i32) {
    %c1_i32 = arith.constant 1 : i32
    %0 = arith.muli %arg0, %c1_i32 : i32
    %1 = arith.addi %0, %arg1 : i32
    %c0_i32 = arith.constant 0 : i32
    %c0_i32_0 = arith.constant 0 : i32
    %c0_i32_1 = arith.constant 0 : i32
    return %c0_i32, %c0_i32_0, %1 : i32, i32, i32
  }
  func.func @transform_2(%arg0: i32, %arg1: i32) -> (i32, i32) {
    %c1_i32 = arith.constant 1 : i32
    %0 = arith.muli %arg0, %c1_i32 : i32
    %1 = arith.addi %0, %arg1 : i32
    %c0_i32 = arith.constant 0 : i32
    %c0_i32_0 = arith.constant 0 : i32
    return %c0_i32, %1 : i32, i32
  }
  func.func @transform_3(%arg0: i32, %arg1: i32) -> (i32, i32, i32) {
    %c0_i32 = arith.constant 0 : i32
    %c0_i32_0 = arith.constant 0 : i32
    %c0_i32_1 = arith.constant 0 : i32
    return %arg0, %c0_i32, %c0_i32_0 : i32, i32, i32
  }
}

</mosaic_0001>

<bundles_post_ra>
// kernel: tpu_custom_call.1
= control target key start
LH: loop header
LB: loop body
LE: loop exit
PB: predicated region body
PF: predicated region fallthrough
CT: control target
= control target key end

     0   :  { %8 = vsyncpa [#allocation3], 0  ;;  %s854_s0 = inlined_call_operand.hbm [shape: f32[8,256], index: 0, kind: input, shape index: {}]   ;;  %s855_s1 = inlined_call_operand.hbm [shape: f32[3,8,256], index: 1, kind: input, shape index: {}]   ;;  %s856_s2 = inlined_call_operand.hbm [shape: f32[13,256], index: 2, kind: input, shape index: {}]   ;;  %s857_s3 = inlined_call_operand.hbm [shape: f32[1,8,128], index: 3, kind: output, shape index: {}]  }
   0x1   :  { %9 = vsyncpa [#allocation6], 0 }
   0x2   :  { %10 = vsyncpa [#allocation4], 0  ;;  %s622_s12 = smov [#allocation5]   ;;  %s528_s16 = scalar_lea.hbm %s855_s1, 768 }
   0x3   :  { %s34_s13 = sshll.u32 %s622_s12, 4  ;;  %p529_p0 = scmp.ne.s32.totalorder %s855_s1, %s528_s16  ;;  %s35_s13 = int_to_ptr.vmem [resolvable:$true] %s34_s13 }
   0x4   :  { %p532_p1 = scmp.lt.u32.totalorder %s528_s16, %s855_s1 }
   0x6   :  { %p534_p2 = pnand %p532_p1, %p529_p0 }
   0x8   :  { %537 = shalt.err (!%p534_p2)
}
   0x9   :  { %s538_s21 = scalar_lea.vmem %s35_s13, 768  ;;  %p543_p4 = scmp.lt.s32.totalorder %s35_s13, %s35_s13 }
   0xa   :  { %p539_p3 = scmp.ne.s32.totalorder %s35_s13, %s538_s21  ;;  %p544_p5 = scmp.lt.s32.totalorder %s538_s21, %s538_s21 }
   0xc   :  { %p545_p6 = por %p544_p5, %p543_p4 }
   0xe   :  { %p546_p7 = pnand %p545_p6, %p539_p3 }
  0x10   :  { %549 = shalt.err (!%p546_p7)
}
  0x11   :  { %s623_s22 = smov 256   ;;  %s624_s23 = smov 16  }
  0x12   :  { %40 = dma.hbm_to_vmem [thread:$0]  %s855_s1, 768, %s35_s13, [#allocation6], %s623_s22, %s623_s22, %s624_s23  }
  0x13   :  { %s625_s26 = smov [#allocation2]   ;;  %s626_s28 = smov [#allocation7]  }
  0x14   :  { %s21_s27 = sshll.u32 %s625_s26, 4  ;;  %s50_s29 = sshll.u32 %s626_s28, 4  ;;  %s22_s27 = int_to_ptr.vmem [resolvable:$true] %s21_s27  ;;  %s51_s29 = int_to_ptr.vmem [resolvable:$true] %s50_s29 }
  0x15   :  { %s550_s5 = scalar_lea.hbm %s854_s0, 256 }
  0x16   :  { %p551_p8 = scmp.ne.s32.totalorder %s854_s0, %s550_s5  ;;  %p554_p9 = scmp.lt.u32.totalorder %s550_s5, %s854_s0 }
  0x18   :  { %p556_p10 = pnand %p554_p9, %p551_p8 }
  0x1a   :  { %559 = shalt.err (!%p556_p10)
}
  0x1b   :  { %s560_s1 = scalar_lea.vmem %s22_s27, 256  ;;  %p565_p12 = scmp.lt.s32.totalorder %s22_s27, %s22_s27 }
  0x1c   :  { %p561_p11 = scmp.ne.s32.totalorder %s22_s27, %s560_s1  ;;  %p566_p13 = scmp.lt.s32.totalorder %s560_s1, %s560_s1 }
  0x1e   :  { %p567_p0 = por %p566_p13, %p565_p12 }
  0x20   :  { %p568_p1 = pnand %p567_p0, %p561_p11 }
  0x22   :  { %571 = shalt.err (!%p568_p1)
}
  0x23   :  { %24 = dma.hbm_to_vmem [thread:$0]  %s854_s0, 256, %s22_s27, [#allocation3]  }
  0x24   :  { %s572_s14 = scalar_lea.hbm %s856_s2, 512 }
  0x25   :  { %p573_p2 = scmp.ne.s32.totalorder %s856_s2, %s572_s14  ;;  %p576_p3 = scmp.lt.u32.totalorder %s572_s14, %s856_s2 }
  0x27   :  { %p578_p4 = pnand %p576_p3, %p573_p2 }
  0x29   :  { %581 = shalt.err (!%p578_p4)
}
  0x2a   :  { %s582_s19 = scalar_lea.vmem %s51_s29, 512  ;;  %p587_p6 = scmp.lt.s32.totalorder %s51_s29, %s51_s29 }
  0x2b   :  { %p583_p5 = scmp.ne.s32.totalorder %s51_s29, %s582_s19  ;;  %p588_p7 = scmp.lt.s32.totalorder %s582_s19, %s582_s19 }
  0x2d   :  { %p589_p8 = por %p588_p7, %p587_p6 }
  0x2f   :  { %p590_p9 = pnand %p589_p8, %p583_p5 }
  0x31   :  { %593 = shalt.err (!%p590_p9)
}
  0x32   :  { %56 = dma.hbm_to_vmem [thread:$0]  %s856_s2, 512, %s51_s29, [#allocation6], %s623_s22, %s623_s22, %s624_s23  }
  0x33   :  { %616 = dma.done.wait [#allocation3], 256  }
  0x34   :  { %617 = vsyncadd [#allocation3], 4294967040 }
  0x35   :  { %618 = dma.done.wait [#allocation6], 1280  }
  0x36   :  { %619 = vsyncadd [#allocation6], 4294966016  ;;  %v207_v0 = vlaneseq  ;;  %v137_v1 = vld [vmem:[#allocation5] sm:$0xff]  ;;  %v138_v2 = vld [vmem:[#allocation5 + $0x8] sm:$0xff]  ;;  %vm217_vm0 = vcmask 1042432   ;;  %vm257_vm1 = vcmask 1041408  }
  0x37   :  { %v140_v3 = vld [vmem:[#allocation5 + $0x10] sm:$0xff]  ;;  %v141_v5 = vld [vmem:[#allocation5 + $0x18] sm:$0xff]  ;;  %v143_v6 = vld [vmem:[#allocation5 + $0x20] sm:$0xff]  ;;  %v145_v8 = vmul.f32 %v137_v1, %v137_v1  ;;  %v146_v9 = vmul.f32 %v138_v2, %v138_v2  ;;  %vm236_vm2 = vcmask 1040384   ;;  %vm627_vm6 = vmmov 1   ;;  %s629_s25 = smov [#allocation8]  }
  0x38   :  { %v692_v4 = vshrl.u32 %v207_v0, 7  ;;  %v144_v7 = vld [vmem:[#allocation5 + $0x28] sm:$0xff]  ;;  %v147_v10 = vmul.f32 %v140_v3, %v140_v3  ;;  %v148_v11 = vmul.f32 %v141_v5, %v141_v5  ;;  %v151_v12 = vmul.f32 %v143_v6, %v143_v6  ;;  %v694_v14 = vld [vmem:[#allocation7] sm:$0xff]  ;;  %v696_v15 = vld [vmem:[#allocation7 + $0x8] sm:$0xff]  ;;  %s470_s26 = sshll.u32 %s629_s25, 4  ;;  %s471_s26 = int_to_ptr.vmem [resolvable:$true] %s470_s26 }
  0x39   :  { %v152_v13 = vmul.f32 %v144_v7, %v144_v7  ;;  %v698_v16 = vld [vmem:[#allocation7 + $0x10] sm:$0x1f]  ;;  %v700_v18 = vld [vmem:[#allocation7 + $0x18] sm:$0x1f]  ;;  %v193_v19 = vrot.slane %v694_v14, 3  ;;  %v194_v20 = vrot.slane %v696_v15, 3  ;;  %v249_v23 = vmul.f32 %v694_v14, %v694_v14  ;;  %p599_p11 = scmp.lt.s32.totalorder %s471_s26, %s471_s26 }
  0x3a   :  { %v149_v17 = vadd.f32 %v147_v10, %v145_v8  ;;  %v150_v21 = vadd.f32 %v148_v11, %v146_v9  ;;  %v209_v22 = vsub.s32 4, %v692_v4  ;;  %v250_v24 = vmul.f32 %v696_v15, %v696_v15  ;;  %v97_v5 = vld [vmem:[#allocation2] sm:$0xff]  ;;  %s594_s27 = scalar_lea.vmem %s471_s26, 128 }
  0x3b   :  { %v197_v26 = vsub.f32 %v694_v14, %v193_v19  ;;  %v198_v27 = vsub.f32 %v696_v15, %v194_v20  ;;  %v251_v28 = vmul.f32 %v698_v16, %v698_v16  ;;  %v252_v30 = vmul.f32 %v700_v18, %v700_v18  ;;  %p595_p10 = scmp.ne.s32.totalorder %s471_s26, %s594_s27  ;;  %p600_p12 = scmp.lt.s32.totalorder %s594_s27, %s594_s27 }
  0x3c   :  { %v709_v25 = vadd.f32 %v151_v12, %v149_v17  ;;  %v715_v29 = vadd.f32 %v152_v13, %v150_v21  ;;  %v258_v31 = vrot.slane %v249_v23, 6  ;;  %v261_v32 = vrot.slane %v250_v24, 6 }
  0x3d   :  { %v210_v33 = vrot.slane %v698_v16, %v209_v22  ;;  %v214_v34 = vrot.slane %v700_v18, %v209_v22  ;;  %v199_v35 = vand.u32 2147483647, %v197_v26  ;;  %v200_v36 = vand.u32 2147483647, %v198_v27  ;;  %v98_v27 = vld [vmem:[#allocation2 + $0x8] sm:$0xff]  ;;  %p601_p13 = por %p600_p12, %p599_p11 }
  0x3e   :  { %504 = vrsqrt.f32 %v709_v25  ;;  %vm157_vm3 = vcmp.eq.f32.partialorder %v709_v25, inf  ;;  %v259_v37 = vrot.slane %v251_v28, 6  ;;  %v262_v38 = vrot.slane %v252_v30, 6 }
  0x3f   :  { %506 = vrsqrt.f32 %v715_v29  ;;  %v302_v39 = vrot.slane %v251_v28, 1  ;;  %v303_v40 = vrot.slane %v252_v30, 1  ;;  %v232_v41 = vrot.slane %v698_v16, 4  ;;  %p602_p0 = pnand %p601_p13, %p595_p10 }
  0x40   :  { %v233_v42 = vrot.slane %v700_v18, 4  ;;  %vm201_vm4 = vweird.f32 %v199_v35  ;;  %vm726_vm5 = vweird.f32 %v200_v36  ;;  %v260_v44 = vsel %vm257_vm1, %v258_v31, %v259_v37 }
  0x41   :  { %v263_v45 = vsel %vm257_vm1, %v261_v32, %v262_v38  ;;  %vm203_vm7 = vmxor %vm201_vm4, %vm627_vm6  ;;  %v266_v46 = vsel %vm217_vm0, %v260_v44, 0.0  ;;  %v306_v48 = vsel %vm217_vm0, %v302_v39, 0.0  ;;  %v313_v49 = vsel %vm217_vm0, %v303_v40, 0.0 }
  0x42   :  { %v273_v47 = vsel %vm217_vm0, %v263_v45, 0.0  ;;  %vm159_vm8 = vcmp.eq.f32.partialorder %v709_v25, 0.0  ;;  %v267_v50 = vrot.slane %v266_v46, 4  ;;  %v307_v52 = vrot.slane %v306_v48, 4  ;;  %vm204_vm10 = vmxor %vm726_vm5, %vm627_vm6 }
  0x43   :  { %v274_v51 = vrot.slane %v273_v47, 4  ;;  %v160_v53 = vand.u32 2147483648, %v709_v25  ;;  %vm164_vm9 = vcmp.eq.f32.partialorder %v715_v29, inf  ;;  %v205_v54 = vsel %vm203_vm7, %v199_v35, 0.0 }
  0x44   :  { %v314_v55 = vrot.slane %v313_v49, 4  ;;  %v268_v56 = vadd.f32 %v267_v50, %v266_v46  ;;  %v308_v58 = vadd.f32 %v307_v52, %v306_v48  ;;  %v237_v59 = vsel %vm236_vm2, %v232_v41, 0.0 }
  0x45   :  { %v275_v57 = vadd.f32 %v274_v51, %v273_v47  ;;  %vm166_vm11 = vcmp.eq.f32.partialorder %v715_v29, 0.0  ;;  %v167_v60 = vand.u32 2147483648, %v715_v29  ;;  %v238_v62 = vsel %vm236_vm2, %v233_v42, 0.0 }
  0x46   :  { %v315_v61 = vadd.f32 %v314_v55, %v313_v49  ;;  %v206_v0 = vsel %vm204_vm10, %v200_v36, 0.0  ;;  %v269_v1 = vrot.slane %v268_v56, 2  ;;  %v309_v3 = vrot.slane %v308_v58, 2 }
  0x47   :  { %v276_v2 = vrot.slane %v275_v57, 2  ;;  %v215_v8 = vmul.f32 %v210_v33, %v205_v54  ;;  %v239_v10 = vadd.f32 %v238_v62, %v237_v59  ;;  %v216_v20 = vmul.f32 %v214_v34, %v206_v0 }
  0x48   :  { %v505_v63 = vpop.eup %504  ;;  %v316_v9 = vrot.slane %v315_v61, 2  ;;  %v270_v12 = vadd.f32 %v269_v1, %v268_v56  ;;  %v310_v17 = vadd.f32 %v309_v3, %v308_v58  ;;  %vm99_vm12 = vcmp.gt.f32.partialorder %v97_v5, 0.0 }
  0x49   :  { %v507_v6 = vpop.eup %506  ;;  %v156_v7 = vmul.f32 %v505_v63, %v709_v25  ;;  %v277_v13 = vadd.f32 %v276_v2, %v275_v57  ;;  %240 = vadd.xlane.f32.xlu1 %v239_v10  ;;  %vm100_vm13 = vcmp.gt.f32.partialorder %v98_v27, 0.0  ;;  %v218_v40 = vsel %vm217_vm0, %v215_v8, 0.0 }
  0x4a   :  { %v163_v11 = vmul.f32 %v507_v6, %v715_v29  ;;  %v317_v21 = vadd.f32 %v316_v9, %v315_v61  ;;  %v271_v24 = vrot.slane %v270_v12, 1  ;;  %v311_v31 = vrot.slane %v310_v17, 1 }
  0x4b   :  { %v158_v19 = vsel %vm157_vm3, %v709_v25, %v156_v7  ;;  %v278_v26 = vrot.slane %v277_v13, 1  ;;  %v628_v25 = vmov 0.0   ;;  %v219_v41 = vsel %vm217_vm0, %v216_v20, 0.0 }
  0x4c   :  { %v161_v22 = vsel %vm159_vm8, %v160_v53, %v158_v19  ;;  %v165_v23 = vsel %vm164_vm9, %v715_v29, %v163_v11  ;;  %v318_v32 = vrot.slane %v317_v21, 1  ;;  %v759_v34 = vadd.f32 %v271_v24, %v270_v12 }
  0x4d   :  { %v168_v28 = vsel %vm166_vm11, %v167_v60, %v165_v23  ;;  %v484_v30 = vadd.f32 -1.0, %v161_v22  ;;  %v761_v35 = vadd.f32 %v278_v26, %v277_v13  ;;  %v480_v36 = vsel %vm99_vm12, 1.0, %v628_v25 }
  0x4e   :  { %v485_v33 = vadd.f32 -1.0, %v168_v28  ;;  %v763_v38 = vadd.f32 %v311_v31, %v310_v17  ;;  %508 = vrsqrt.f32 %v759_v34  ;;  %v767_v29 = vadd.f32 %v318_v32, %v317_v21 }
  0x4f   :  { %v171_v37 = vmul.f32 %v484_v30, %v484_v30  ;;  %510 = vrsqrt.f32 %v761_v35  ;;  %v105_v42 = vrot.slane %v480_v36, 4  ;;  %v481_v43 = vsel %vm100_vm13, 1.0, %v628_v25 }
  0x50   :  { %v172_v39 = vmul.f32 %v485_v33, %v485_v33  ;;  %512 = vrsqrt.f32 %v763_v38  ;;  %v220_v46 = vadd.f32 %v219_v41, %v218_v40  ;;  %vm282_vm5 = vcmp.eq.f32.partialorder %v759_v34, inf }
  0x51   :  { %vm173_vm14 = vweird.f32 %v171_v37  ;;  %514 = vrsqrt.f32 %v767_v29  ;;  %vm284_vm7 = vcmp.eq.f32.partialorder %v759_v34, 0.0  ;;  %v106_v48 = vmax.f32 %v480_v36, %v105_v42 }
  0x52   :  { %vm174_vm15 = vweird.f32 %v172_v39  ;;  %vm175_vm3 = vmxor %vm173_vm14, %vm627_vm6  ;;  %v111_v49 = vrot.slane %v481_v43, 4  ;;  %v285_v50 = vand.u32 2147483648, %v759_v34  ;;  %vm289_vm8 = vcmp.eq.f32.partialorder %v761_v35, inf }
  0x53   :  { %vm176_vm4 = vmxor %vm174_vm15, %vm627_vm6  ;;  %v177_v44 = vsel %vm175_vm3, %v171_v37, 0.0  ;;  %vm117_vm9 = vcmp.lt.f32.partialorder %v97_v5, 0.0  ;;  %vm118_vm10 = vcmp.lt.f32.partialorder %v98_v27, 0.0  ;;  %v107_v51 = vrot.slane %v106_v48, 2 }
  0x54   :  { %v178_v45 = vsel %vm176_vm4, %v172_v39, 0.0  ;;  %v112_v52 = vmax.f32 %v481_v43, %v111_v49  ;;  %v482_v53 = vsel %vm117_vm9, 1.0, %v628_v25  ;;  %v483_v54 = vsel %vm118_vm10, 1.0, %v628_v25 }
  0x55   :  { %v181_v47 = vadd.f32 %v178_v45, %v177_v44  ;;  %vm291_vm11 = vcmp.eq.f32.partialorder %v761_v35, 0.0  ;;  %v292_v55 = vand.u32 2147483648, %v761_v35  ;;  %v123_v56 = vrot.slane %v482_v53, 4 }
  0x56   :  { %v129_v57 = vrot.slane %v483_v54, 4  ;;  %vm322_vm12 = vcmp.eq.f32.partialorder %v763_v38, inf  ;;  %vm324_vm13 = vcmp.eq.f32.partialorder %v763_v38, 0.0  ;;  %v108_v58 = vmax.f32 %v106_v48, %v107_v51 }
  0x57   :  { %182 = vadd.xlane.f32.xlu0 %v181_v47  ;;  %v113_v59 = vrot.slane %v112_v52, 2  ;;  %v325_v61 = vand.u32 2147483648, %v763_v38  ;;  %vm329_vm14 = vcmp.eq.f32.partialorder %v767_v29, inf  ;;  %v124_v62 = vmax.f32 %v482_v53, %v123_v56 }
  0x58   :  { %v509_v60 = vpop.eup %508  ;;  %v130_v63 = vmax.f32 %v483_v54, %v129_v57  ;;  %vm331_vm15 = vcmp.eq.f32.partialorder %v767_v29, 0.0  ;;  %v109_v2 = vrot.slane %v108_v58, 1  ;;  %v332_v7 = vand.u32 2147483648, %v767_v29 }
  0x59   :  { %v511_v0 = vpop.eup %510  ;;  %v281_v1 = vmul.f32 %v509_v60, %v759_v34  ;;  %v114_v3 = vmax.f32 %v112_v52, %v113_v59  ;;  %v125_v8 = vrot.slane %v124_v62, 2  ;;  %vm449_vm10 = vcmp.eq.s32.totalorder %v692_v4, 2 }
  0x5a   :  { %v513_v5 = vpop.eup %512  ;;  %v288_v6 = vmul.f32 %v511_v0, %v761_v35  ;;  %v131_v9 = vrot.slane %v130_v63, 2  ;;  %v110_v12 = vmax.f32 %v108_v58, %v109_v2 }
  0x5b   :  { %221 = vadd.xlane.f32.xlu0 %v220_v46  ;;  %v283_v10 = vsel %vm282_vm5, %v759_v34, %v281_v1  ;;  %v321_v11 = vmul.f32 %v513_v5, %v763_v38  ;;  %v115_v13 = vrot.slane %v114_v3, 1  ;;  %v515_v17 = vpop.eup %514  ;;  %v126_v21 = vmax.f32 %v124_v62, %v125_v8 }
  0x5c   :  { %v286_v19 = vsel %vm284_vm7, %v285_v50, %v283_v10  ;;  %v290_v20 = vsel %vm289_vm8, %v761_v35, %v288_v6  ;;  %v132_v22 = vmax.f32 %v130_v63, %v131_v9  ;;  %v328_v27 = vmul.f32 %v515_v17, %v767_v29 }
  0x5d   :  { %v293_v23 = vsel %vm291_vm11, %v292_v55, %v290_v20  ;;  %v294_v24 = vadd.f32 1e-06, %v286_v19  ;;  %v323_v26 = vsel %vm322_vm12, %v763_v38, %v321_v11  ;;  %v116_v31 = vmax.f32 %v114_v3, %v115_v13 }
  0x5e   :  { %v295_v28 = vadd.f32 1e-06, %v293_v23  ;;  %v326_v30 = vsel %vm324_vm13, %v325_v61, %v323_v26  ;;  %v127_v32 = vrot.slane %v126_v21, 1  ;;  %v330_v33 = vsel %vm329_vm14, %v767_v29, %v328_v27 }
  0x5f   :  { %516 = vrcp.f32 %v294_v24  ;;  %v334_v34 = vadd.f32 1e-06, %v326_v30  ;;  %v133_v35 = vrot.slane %v132_v22, 1  ;;  %v333_v25 = vsel %vm331_vm15, %v332_v7, %v330_v33 }
  0x60   :  { %518 = vrcp.f32 %v295_v28  ;;  %v128_v36 = vmax.f32 %v126_v21, %v127_v32  ;;  %v335_v37 = vadd.f32 1e-06, %v333_v25  ;;  %vm453_vm11 = vcmp.eq.s32.totalorder %v692_v4, 3 }
  0x61   :  { %520 = vrcp.f32 %v334_v34  ;;  %v134_v39 = vmax.f32 %v132_v22, %v133_v35  ;;  %vm457_vm12 = vcmp.eq.s32.totalorder %v692_v4, 4 }
  0x62   :  { %v135_v40 = vmul.f32 %v128_v36, %v110_v12  ;;  %522 = vrcp.f32 %v335_v37 }
  0x63   :  { %v136_v38 = vmul.f32 %v134_v39, %v116_v31 }
  0x64   :  { %v812_v41 = vmul.f32 %v135_v40, %v698_v16 }
  0x65   :  { %v815_v42 = vmul.f32 %v136_v38, %v700_v18 }
  0x66   :  { %v424_v43 = vrot.slane %v812_v41, 4 }
  0x67   :  { %v425_v44 = vrot.slane %v815_v42, 4 }
  0x68   :  { %v428_v29 = vsel %vm236_vm2, %v424_v43, 0.0 }
  0x69   :  { %v517_v45 = vpop.eup %516  ;;  %v429_v46 = vsel %vm236_vm2, %v425_v44, 0.0 }
  0x6a   :  { %v519_v47 = vpop.eup %518  ;;  %v430_v48 = vadd.f32 %v429_v46, %v428_v29  ;;  %v297_v50 = vmul.f32 %v517_v45, %v694_v14  ;;  %v300_v51 = vmul.f32 %v517_v45, %v698_v16 }
  0x6b   :  { %v521_v49 = vpop.eup %520  ;;  %v299_v54 = vmul.f32 %v519_v47, %v696_v15  ;;  %v301_v55 = vmul.f32 %v519_v47, %v700_v18 }
  0x6c   :  { %v337_v52 = vmul.f32 %v521_v49, %v698_v16  ;;  %431 = vadd.xlane.f32.xlu0 %v430_v48  ;;  %v523_v53 = vpop.eup %522 }
  0x6d   :  { %v339_v56 = vmul.f32 %v523_v53, %v700_v18 }
  0x6e   :  { %v342_v57 = vrot.slane %v337_v52, 3 }
  0x6f   :  { %v343_v58 = vrot.slane %v339_v56, 3 }
  0x70   :  { %v346_v59 = vsub.f32 %v297_v50, %v342_v57  ;;  %v348_v60 = vsub.f32 %v300_v51, %v342_v57 }
  0x71   :  { %v347_v61 = vsub.f32 %v299_v54, %v343_v58  ;;  %v349_v62 = vsub.f32 %v301_v55, %v343_v58 }
  0x72   :  { %v350_v63 = vmul.f32 %v346_v59, %v346_v59  ;;  %v352_v14 = vmul.f32 %v348_v60, %v348_v60 }
  0x73   :  { %v351_v0 = vmul.f32 %v347_v61, %v347_v61  ;;  %v353_v1 = vmul.f32 %v349_v62, %v349_v62 }
  0x74   :  { %v358_v2 = vrot.slane %v350_v63, 6  ;;  %v359_v16 = vrot.slane %v352_v14, 6 }
  0x75   :  { %v361_v5 = vrot.slane %v351_v0, 6  ;;  %v362_v15 = vrot.slane %v353_v1, 6 }
  0x76   :  { %v360_v3 = vsel %vm257_vm1, %v358_v2, %v359_v16 }
  0x77   :  { %v366_v6 = vsel %vm217_vm0, %v360_v3, 0.0  ;;  %v363_v18 = vsel %vm257_vm1, %v361_v5, %v362_v15 }
  0x78   :  { %v367_v7 = vrot.slane %v366_v6, 4  ;;  %v373_v8 = vsel %vm217_vm0, %v363_v18, 0.0 }
  0x79   :  { %v374_v10 = vrot.slane %v373_v8, 4 }
  0x7a   :  { %v368_v9 = vadd.f32 %v367_v7, %v366_v6 }
  0x7b   :  { %v375_v12 = vadd.f32 %v374_v10, %v373_v8 }
  0x7c   :  { %v369_v11 = vrot.slane %v368_v9, 2 }
  0x7d   :  { %v376_v17 = vrot.slane %v375_v12, 2 }
  0x7e   :  { %v370_v13 = vadd.f32 %v369_v11, %v368_v9 }
  0x7f   :  { %v377_v19 = vadd.f32 %v376_v17, %v375_v12 }
  0x80   :  { %v371_v20 = vrot.slane %v370_v13, 1 }
  0x81   :  { %v378_v22 = vrot.slane %v377_v19, 1 }
  0x82   :  { %v372_v21 = vadd.f32 %v371_v20, %v370_v13 }
  0x83   :  { %v379_v23 = vadd.f32 %v378_v22, %v377_v19 }
  0x84   :  { %524 = vrsqrt.f32 %v372_v21  ;;  %vm382_vm3 = vcmp.eq.f32.partialorder %v372_v21, inf  ;;  %v385_v26 = vand.u32 2147483648, %v372_v21  ;;  %vm384_vm1 = vcmp.eq.f32.partialorder %v372_v21, 0.0 }
  0x85   :  { %526 = vrsqrt.f32 %v379_v23  ;;  %vm389_vm0 = vcmp.eq.f32.partialorder %v379_v23, inf  ;;  %v392_v30 = vand.u32 2147483648, %v379_v23  ;;  %vm391_vm4 = vcmp.eq.f32.partialorder %v379_v23, 0.0 }
  0x8e   :  { %v525_v24 = vpop.eup %524 }
  0x8f   :  { %v381_v27 = vmul.f32 %v525_v24, %v372_v21  ;;  %v527_v28 = vpop.eup %526 }
  0x90   :  { %v388_v32 = vmul.f32 %v527_v28, %v379_v23 }
  0x91   :  { %v383_v31 = vsel %vm382_vm3, %v372_v21, %v381_v27 }
  0x92   :  { %v386_v33 = vsel %vm384_vm1, %v385_v26, %v383_v31  ;;  %v390_v34 = vsel %vm389_vm0, %v379_v23, %v388_v32 }
  0x93   :  { %vm394_vm5 = vweird.f32 %v386_v33  ;;  %v393_v35 = vsel %vm391_vm4, %v392_v30, %v390_v34 }
  0x94   :  { %vm396_vm7 = vmxor %vm394_vm5, %vm627_vm6  ;;  %vm395_vm8 = vweird.f32 %v393_v35 }
  0x95   :  { %v398_v25 = vsel %vm396_vm7, %v386_v33, 0.0  ;;  %vm397_vm9 = vmxor %vm395_vm8, %vm627_vm6  ;;  %vm445_vm6 = vcmp.eq.s32.totalorder %v692_v4, 1 }
  0x96   :  { %v402_v36 = vmul.f32 %v812_v41, %v398_v25  ;;  %v399_v37 = vsel %vm397_vm9, %v393_v35, 0.0 }
  0x97   :  { %v403_v39 = vmul.f32 %v815_v42, %v399_v37 }
  0x98   :  { %v406_v40 = vrot.slane %v402_v36, 4 }
  0x99   :  { %v407_v38 = vrot.slane %v403_v39, 4 }
  0x9a   :  { %v410_v43 = vsel %vm236_vm2, %v406_v40, 0.0 }
  0x9b   :  { %v411_v44 = vsel %vm236_vm2, %v407_v38, 0.0  ;;  %vm442_vm2 = vcmp.eq.s32.totalorder %v692_v4, 0 }
  0x9c   :  { %v412_v29 = vadd.f32 %v411_v44, %v410_v43 }
  0x9e   :  { %413 = vadd.xlane.f32.xlu1 %v412_v29 }
  0xd6   :  { %v241_v45 = vpop.xlane.xlu1 %240 }
  0xd7   :  { %v242_v46 = vrot.slane %v241_v45, 4 }
  0xd9   :  { %v243_v47 = vadd.f32 %v242_v46, %v241_v45 }
  0xdb   :  { %v244_v50 = vrot.slane %v243_v47, 2 }
  0xdd   :  { %v245_v54 = vadd.f32 %v244_v50, %v243_v47 }
  0xdf   :  { %v246_v58 = vrot.slane %v245_v54, 1 }
  0xe1   :  { %v247_v62 = vadd.f32 %v246_v58, %v245_v54 }
  0xe4   :  { %v183_v48 = vpop.xlane.xlu0 %182 }
  0xe5   :  { %v184_v49 = vrot.slane %v183_v48, 4 }
  0xe7   :  { %v185_v51 = vadd.f32 %v184_v49, %v183_v48 }
  0xe8   :  { %v222_v52 = vpop.xlane.xlu0 %221 }
  0xe9   :  { %v186_v41 = vrot.slane %v185_v51, 2  ;;  %v223_v53 = vrot.slane %v222_v52, 4 }
  0xeb   :  { %v224_v42 = vadd.f32 %v223_v53, %v222_v52  ;;  %v187_v55 = vadd.f32 %v186_v41, %v185_v51 }
  0xed   :  { %v225_v56 = vrot.slane %v224_v42, 2  ;;  %v188_v57 = vrot.slane %v187_v55, 1 }
  0xef   :  { %v189_v59 = vadd.f32 %v188_v57, %v187_v55  ;;  %v226_v60 = vadd.f32 %v225_v56, %v224_v42 }
  0xf1   :  { %486 = vpush %v189_v59  ;;  %v227_v61 = vrot.slane %v226_v60, 1 }
  0xf3   :  { %v228_v63 = vadd.f32 %v227_v61, %v226_v60 }
  0xf5   :  { %488 = vpush %v228_v63 }
  0xf6   :  { %490 = vpush %v247_v62 }
  0xf9   :  { %v432_v14 = vpop.xlane.xlu0 %431 }
  0xfa   :  { %v433_v0 = vrot.slane %v432_v14, 4 }
  0xfc   :  { %v434_v1 = vadd.f32 %v433_v0, %v432_v14 }
  0xfe   :  { %v435_v2 = vrot.slane %v434_v1, 2 }
 0x100   :  { %v436_v15 = vadd.f32 %v435_v2, %v434_v1 }
 0x102   :  { %v437_v7 = vrot.slane %v436_v15, 1 }
 0x104   :  { %v438_v10 = vadd.f32 %v437_v7, %v436_v15 }
 0x122   :  { %s487_s2 = spop %486 }
 0x123   :  { %v443_v11 = vstv %s487_s2 }
 0x124   :  { %v444_v13 = vsel %vm442_vm2, %v443_v11, 0.0 }
 0x126   :  { %s489_s21 = spop %488 }
 0x127   :  { %v446_v12 = vstv %s489_s21  ;;  %s491_s22 = spop %490 }
 0x128   :  { %v447_v17 = vsel %vm445_vm6, %v446_v12, 0.0  ;;  %v450_v19 = vstv %s491_s22 }
 0x129   :  { %v448_v20 = vadd.f32 %v447_v17, %v444_v13  ;;  %v451_v21 = vsel %vm449_vm10, %v450_v19, 0.0 }
 0x12b   :  { %v414_v16 = vpop.xlane.xlu1 %413  ;;  %v452_v22 = vadd.f32 %v451_v21, %v448_v20 }
 0x12c   :  { %v415_v3 = vrot.slane %v414_v16, 4 }
 0x12e   :  { %v416_v5 = vadd.f32 %v415_v3, %v414_v16 }
 0x130   :  { %v417_v6 = vrot.slane %v416_v5, 2 }
 0x132   :  { %v418_v18 = vadd.f32 %v417_v6, %v416_v5 }
 0x134   :  { %v419_v8 = vrot.slane %v418_v18, 1 }
 0x136   :  { %v420_v9 = vadd.f32 %v419_v8, %v418_v18 }
 0x138   :  { %492 = vpush %v420_v9 }
 0x139   :  { %494 = vpush %v438_v10 }
 0x169   :  { %s493_s23 = spop %492 }
 0x16a   :  { %v454_v23 = vstv %s493_s23  ;;  %s495_s24 = spop %494 }
 0x16b   :  { %v455_v24 = vsel %vm453_vm11, %v454_v23, 0.0  ;;  %v458_v26 = vstv %s495_s24 }
 0x16c   :  { %v456_v27 = vadd.f32 %v455_v24, %v452_v22  ;;  %v459_v28 = vsel %vm457_vm12, %v458_v26, 0.0 }
 0x16e   :  { %v460_v30 = vadd.f32 %v459_v28, %v456_v27 }
 0x170   :  { %463 = vst [vmem:[#allocation8] sm:$0xff] %v460_v30 }
 0x171   :  { %605 = shalt.err (!%p602_p0)
}
 0x172   :  { %s606_s30 = scalar_lea.hbm %s857_s3, 128 }
 0x173   :  { %p607_p1 = scmp.ne.s32.totalorder %s857_s3, %s606_s30  ;;  %p610_p2 = scmp.lt.u32.totalorder %s606_s30, %s857_s3 }
 0x175   :  { %p612_p3 = pnand %p610_p2, %p607_p1 }
 0x177   :  { %615 = shalt.err (!%p612_p3)
}
 0x178   :  { %473 = dma.vmem_to_hbm [thread:$0]  %s471_s26, 128, %s857_s3, [#allocation4]  }
 0x179   :  { %620 = dma.done.wait [#allocation4], 128  }
 0x17a   :  { %621 = vsyncadd [#allocation4], 4294967168 }
 0x17b   :  { %477 = vsyncpa [#allocation3], 1 }
 0x17c   :  { %478 = vsyncpa [#allocation6], 1 }
 0x17d   :  { %479 = vsyncpa [#allocation4], 1 }

</bundles_post_ra>
